<compile_context>
chip_gen: v7x
topology: tpu7x:2x2x1
jax: 0.10.0
libtpu: 0.0.40
codegen_flags: <defaults>
</compile_context>

<pallas_src>
import functools

import jax
import jax.numpy as jnp
from jax.experimental import pallas as pl
from jax.experimental.pallas import tpu as pltpu


def _ab_embeddings_kernel(ids_ref, pos_ref, table_ref, gamma_ref, beta_ref,
                          out_ref, *, vocab_size, hidden_size, eps):
    T = ids_ref.shape[0]           # tokens in this block (block_b * S)
    K = table_ref.shape[0]         # V + P (fused table rows)
    Hp = table_ref.shape[1]        # hidden size padded to a multiple of 128

    ids = ids_ref[...]             # (T, 1) int32 token ids
    pos = pos_ref[...]             # (T, 1) int32 position ids (0 at pads)

    # Fused one-hot over the concatenated [AA ; Position] table:
    #   column j selects AA row j          for j <  V
    #   column j selects Position row j-V  for j >= V
    # Each row has (at most) two ones, so one MXU contraction yields
    # aa_table[id] + pos_table[pos].
    cols = jax.lax.broadcasted_iota(jnp.int32, (T, K), 1)
    onehot = jnp.logical_or(cols == ids,
                            cols == pos + vocab_size).astype(jnp.float32)  # (T, K)

    emb = jnp.dot(onehot, table_ref[...],
                  preferred_element_type=jnp.float32)                      # (T, Hp)

    # LayerNorm over the ORIGINAL hidden width. Padded table columns are zero,
    # so sums over the padded axis equal sums over the first `hidden_size`
    # columns; padded columns are masked out of the variance.
    inv_h = 1.0 / hidden_size
    mean = jnp.sum(emb, axis=-1, keepdims=True) * inv_h
    centered = emb - mean
    if Hp != hidden_size:
        hmask = jax.lax.broadcasted_iota(jnp.int32, (T, Hp), 1) < hidden_size
        centered = jnp.where(hmask, centered, 0.0)
    var = jnp.sum(centered * centered, axis=-1, keepdims=True) * inv_h
    out = centered * jax.lax.rsqrt(var + eps) * gamma_ref[...] + beta_ref[...]

    # Dropout: inference mode -> identity.
    # TODO(synk): add pltpu.prng_seed / prng_random_bits based masking for training mode.
    out_ref[...] = out.astype(out_ref.dtype)


def _pick_block_b(B, S, target_tokens=1024):
    """Batch rows per grid step.

    Aim for ~1024 tokens per step (amortizes the ~0.35us per-step pipeline
    overhead and fills the MXU M dimension), while keeping the grid length >= 2
    when B >= 2 so both v7x TensorCores get work. The chosen block must divide B
    and keep the (block_b*S, Hp) blocks sublane-aligned.
    """
    want = max(1, target_tokens // max(1, S))
    if B >= 2:
        want = min(want, B // 2)          # grid length >= 2 (v7x megacore)
    want = max(want, 1)
    best = None
    for d in range(1, want + 1):
        if B % d == 0 and (d * S) % 8 == 0:
            best = d
    if best is None:
        # Fall back to the whole batch: a block equal to the full array is always
        # a legal block shape (grid length 1).
        return B
    return best


def ab_embeddings(src, aa_table, pos_table, gamma, beta, *,
                  pad_token_id, eps, block_b=None, out_dtype=jnp.float32):
    B, S = src.shape
    V, H = aa_table.shape
    P, H2 = pos_table.shape
    assert H == H2

    # Position ids (cumsum of the non-pad mask, zeroed at pads): trivial O(B*S)
    # integer work done in the wrapper instead of an O(T^2) in-kernel matvec.
    # NOTE: positions >= P silently map to a zero position embedding (the torch
    # reference would raise an index error).
    mask = (src != pad_token_id).astype(jnp.int32)
    pos_ids = jnp.cumsum(mask, axis=1) * mask

    ids_flat = src.reshape(B * S, 1).astype(jnp.int32)
    pos_flat = pos_ids.reshape(B * S, 1).astype(jnp.int32)

    # Fused [AA ; Position] table; pad the hidden axis to a multiple of 128 so
    # the output block stores are lane-dense.
    Hp = ((H + 127) // 128) * 128
    table = jnp.concatenate([aa_table, pos_table], axis=0).astype(jnp.float32)
    if Hp != H:
        padw = ((0, 0), (0, Hp - H))
        table = jnp.pad(table, padw)
        gamma_p = jnp.pad(gamma.astype(jnp.float32), padw)
        beta_p = jnp.pad(beta.astype(jnp.float32), padw)
    else:
        gamma_p = gamma.astype(jnp.float32)
        beta_p = beta.astype(jnp.float32)

    if block_b is None:
        block_b = _pick_block_b(B, S)
    assert B % block_b == 0
    T = block_b * S                      # tokens per grid step
    K = V + P

    # Per-step VMEM working-set estimate (double-buffered blocked operands,
    # resident tables, fused one-hot and f32 intermediates) with headroom,
    # capped to stay within v7x's 64 MiB physical VMEM.
    est = 4 * (2 * 2 * T            # ids + pos blocks, double buffered
               + 2 * K * Hp          # fused table (possibly double buffered)
               + 2 * 2 * Hp          # gamma / beta
               + 2 * T * Hp          # output block, double buffered
               + T * K               # one-hot
               + 3 * T * Hp)         # emb / centered / out intermediates
    vmem_limit = int(min(max(2 * est, 32 << 20), 64 << 20))

    kernel = functools.partial(_ab_embeddings_kernel, vocab_size=V,
                               hidden_size=H, eps=eps)

    out_flat = pl.pallas_call(
        kernel,
        out_shape=jax.ShapeDtypeStruct((B * S, Hp), out_dtype),
        grid=(B // block_b,),
        in_specs=[
            pl.BlockSpec((T, 1), lambda i: (i, 0)),    # token ids for this block
            pl.BlockSpec((T, 1), lambda i: (i, 0)),    # position ids for this block
            pl.BlockSpec((K, Hp), lambda i: (0, 0)),   # fused [AA;Pos] table (resident)
            pl.BlockSpec((1, Hp), lambda i: (0, 0)),   # LayerNorm gamma
            pl.BlockSpec((1, Hp), lambda i: (0, 0)),   # LayerNorm beta
        ],
        out_specs=pl.BlockSpec((T, Hp), lambda i: (i, 0)),
        compiler_params=pltpu.CompilerParams(
            dimension_semantics=("parallel",),
            vmem_limit_bytes=vmem_limit),
    )(ids_flat, pos_flat, table, gamma_p, beta_p)

    out = out_flat[:, :H] if Hp != H else out_flat
    return out.reshape(B, S, H)


def _reference(src, aa_table, pos_table, gamma, beta, pad_token_id, eps):
    inputs_embeds = aa_table[src]
    mask = (src != pad_token_id).astype(jnp.int32)
    pos_ids = jnp.cumsum(mask, axis=1) * mask
    pos_emb = pos_table[pos_ids]
    emb = inputs_embeds + pos_emb
    mean = emb.mean(-1, keepdims=True)
    var = ((emb - mean) ** 2).mean(-1, keepdims=True)
    return (emb - mean) / jnp.sqrt(var + eps) * gamma[0] + beta[0]


if __name__ == "__main__":
    # Small hparams consistent with the module's __init__.
    B, S = 2, 16
    vocab_size = 24
    hidden_size = 32
    max_position_embeddings = 32
    pad_token_id = 21
    layer_norm_eps = 1e-12

    key = jax.random.PRNGKey(0)
    k_ids, k_aa, k_pos = jax.random.split(key, 3)

    # token ids with some padding at the end of each row
    src = jax.random.randint(k_ids, (B, S), 0, vocab_size, dtype=jnp.int32)
    src = src.at[:, -3:].set(pad_token_id)

    # deterministic parameter init (nn.Embedding zeroes the padding_idx row)
    aa_table = 0.02 * jax.random.normal(k_aa, (vocab_size, hidden_size), jnp.float32)
    aa_table = aa_table.at[pad_token_id].set(0.0)
    pos_table = 0.02 * jax.random.normal(
        k_pos, (max_position_embeddings, hidden_size), jnp.float32)
    pos_table = pos_table.at[0].set(0.0)
    gamma = jnp.ones((1, hidden_size), jnp.float32)
    beta = jnp.zeros((1, hidden_size), jnp.float32)

    out = ab_embeddings(src, aa_table, pos_table, gamma, beta,
                        pad_token_id=pad_token_id, eps=layer_norm_eps)
    out = jax.block_until_ready(out)

    ref = _reference(src, aa_table, pos_table, gamma, beta,
                     pad_token_id, layer_norm_eps)
    assert out.shape == (B, S, hidden_size)
    assert jnp.allclose(out, ref, rtol=1e-5, atol=1e-5)

    print("KERNEL_OK")
</pallas_src>

<mosaic_0001>
module attributes {stable_mosaic.version = 11 : i64} {
  func.func @_ab_embeddings_kernel(%arg0: i32, %arg1: memref<16x1xi32, #tpu.memory_space<vmem>>, %arg2: memref<16x1xi32, #tpu.memory_space<vmem>>, %arg3: memref<56x128xf32, #tpu.memory_space<vmem>>, %arg4: memref<1x128xf32, #tpu.memory_space<vmem>>, %arg5: memref<1x128xf32, #tpu.memory_space<vmem>>, %arg6: memref<16x128xf32, #tpu.memory_space<vmem>>) attributes {dimension_semantics = [#tpu.dimension_semantics<parallel>], iteration_bounds = array<i64: 2>, scalar_prefetch = 0 : i64, scratch_operands = 0 : i64, tpu.core_type = #tpu.core_type<tc>, window_params = [{transform_indices = @transform_0, window_bounds = array<i64: 16, 1>}, {transform_indices = @transform_1, window_bounds = array<i64: 16, 1>}, {pipeline_mode = #tpu.pipeline_mode<synchronous>, transform_indices = @transform_2, window_bounds = array<i64: 56, 128>}, {pipeline_mode = #tpu.pipeline_mode<synchronous>, transform_indices = @transform_3, window_bounds = array<i64: 1, 128>}, {pipeline_mode = #tpu.pipeline_mode<synchronous>, transform_indices = @transform_4, window_bounds = array<i64: 1, 128>}, {transform_indices = @transform_5, window_bounds = array<i64: 16, 128>}]} {
    %c0 = arith.constant 0 : index
    %c0_0 = arith.constant 0 : index
    %0 = vector.load %arg1[%c0, %c0_0] : memref<16x1xi32, #tpu.memory_space<vmem>>, vector<16x1xi32>
    %c0_1 = arith.constant 0 : index
    %c0_2 = arith.constant 0 : index
    %1 = vector.load %arg2[%c0_1, %c0_2] : memref<16x1xi32, #tpu.memory_space<vmem>>, vector<16x1xi32>
    %2 = tpu.iota {dimensions = array<i32: 1>} : vector<16x56xi32>
    %3 = vector.broadcast %0 : vector<16x1xi32> to vector<16x56xi32>
    %4 = arith.cmpi eq, %2, %3 : vector<16x56xi32>
    %c24_i32 = arith.constant 24 : i32
    %5 = vector.broadcast %c24_i32 : i32 to vector<16x1xi32>
    %6 = arith.addi %1, %5 : vector<16x1xi32>
    %7 = vector.broadcast %6 : vector<16x1xi32> to vector<16x56xi32>
    %8 = arith.cmpi eq, %2, %7 : vector<16x56xi32>
    %9 = arith.ori %4, %8 : vector<16x56xi1>
    %10 = arith.extui %9 : vector<16x56xi1> to vector<16x56xi32>
    %11 = arith.sitofp %10 : vector<16x56xi32> to vector<16x56xf32>
    %c0_3 = arith.constant 0 : index
    %c0_4 = arith.constant 0 : index
    %12 = vector.load %arg3[%c0_3, %c0_4] : memref<56x128xf32, #tpu.memory_space<vmem>>, vector<56x128xf32>
    %cst = arith.constant dense<0.000000e+00> : vector<16x128xf32>
    %13 = tpu.matmul %11, %12, %cst {dimension_numbers = #tpu.dot_dimension_numbers<[1], [0], [0], [1], [0, 0, 1, 1], [], []>} : vector<16x56xf32>, vector<56x128xf32>, vector<16x128xf32> -> vector<16x128xf32>
    %cst_5 = arith.constant dense<0.000000e+00> : vector<16xf32>
    %14 = vector.multi_reduction <add>, %13, %cst_5 [1] : vector<16x128xf32> to vector<16xf32>
    %15 = vector.shape_cast %14 : vector<16xf32> to vector<16x1xf32>
    %cst_6 = arith.constant 3.125000e-02 : f32
    %16 = vector.broadcast %cst_6 : f32 to vector<16x1xf32>
    %17 = arith.mulf %15, %16 : vector<16x1xf32>
    %18 = vector.broadcast %17 : vector<16x1xf32> to vector<16x128xf32>
    %19 = arith.subf %13, %18 : vector<16x128xf32>
    %20 = tpu.iota {dimensions = array<i32: 1>} : vector<16x128xi32>
    %c32_i32 = arith.constant 32 : i32
    %21 = vector.broadcast %c32_i32 : i32 to vector<16x128xi32>
    %22 = arith.cmpi slt, %20, %21 : vector<16x128xi32>
    %cst_7 = arith.constant 0.000000e+00 : f32
    %23 = vector.broadcast %cst_7 : f32 to vector<16x128xf32>
    %24 = arith.select %22, %19, %23 : vector<16x128xi1>, vector<16x128xf32>
    %25 = arith.mulf %24, %24 : vector<16x128xf32>
    %cst_8 = arith.constant dense<0.000000e+00> : vector<16xf32>
    %26 = vector.multi_reduction <add>, %25, %cst_8 [1] : vector<16x128xf32> to vector<16xf32>
    %27 = vector.shape_cast %26 : vector<16xf32> to vector<16x1xf32>
    %cst_9 = arith.constant 3.125000e-02 : f32
    %28 = vector.broadcast %cst_9 : f32 to vector<16x1xf32>
    %29 = arith.mulf %27, %28 : vector<16x1xf32>
    %cst_10 = arith.constant 9.99999996E-13 : f32
    %30 = vector.broadcast %cst_10 : f32 to vector<16x1xf32>
    %31 = arith.addf %29, %30 : vector<16x1xf32>
    %32 = math.rsqrt %31 : vector<16x1xf32>
    %33 = vector.broadcast %32 : vector<16x1xf32> to vector<16x128xf32>
    %34 = arith.mulf %24, %33 : vector<16x128xf32>
    %c0_11 = arith.constant 0 : index
    %c0_12 = arith.constant 0 : index
    %35 = vector.load %arg4[%c0_11, %c0_12] : memref<1x128xf32, #tpu.memory_space<vmem>>, vector<1x128xf32>
    %36 = vector.broadcast %35 : vector<1x128xf32> to vector<16x128xf32>
    %37 = arith.mulf %34, %36 : vector<16x128xf32>
    %c0_13 = arith.constant 0 : index
    %c0_14 = arith.constant 0 : index
    %38 = vector.load %arg5[%c0_13, %c0_14] : memref<1x128xf32, #tpu.memory_space<vmem>>, vector<1x128xf32>
    %39 = vector.broadcast %38 : vector<1x128xf32> to vector<16x128xf32>
    %40 = arith.addf %37, %39 : vector<16x128xf32>
    %c0_15 = arith.constant 0 : index
    %c0_16 = arith.constant 0 : index
    %41 = vector.load %arg6[%c0_15, %c0_16] : memref<16x128xf32, #tpu.memory_space<vmem>>, vector<16x128xf32>
    tpu.vector_store %arg6[%c0_15, %c0_16], %40 {strides = array<i32>} : memref<16x128xf32, #tpu.memory_space<vmem>>, vector<16x128xf32>,
    return
  }
  func.func @transform_0(%arg0: i32) -> (i32, i32) {
    %c0_i32 = arith.constant 0 : i32
    %c0_i32_0 = arith.constant 0 : i32
    return %arg0, %c0_i32 : i32, i32
  }
  func.func @transform_1(%arg0: i32) -> (i32, i32) {
    %c0_i32 = arith.constant 0 : i32
    %c0_i32_0 = arith.constant 0 : i32
    return %arg0, %c0_i32 : i32, i32
  }
  func.func @transform_2(%arg0: i32) -> (i32, i32) {
    %c0_i32 = arith.constant 0 : i32
    %c0_i32_0 = arith.constant 0 : i32
    %c0_i32_1 = arith.constant 0 : i32
    return %c0_i32, %c0_i32_0 : i32, i32
  }
  func.func @transform_3(%arg0: i32) -> (i32, i32) {
    %c0_i32 = arith.constant 0 : i32
    %c0_i32_0 = arith.constant 0 : i32
    %c0_i32_1 = arith.constant 0 : i32
    return %c0_i32, %c0_i32_0 : i32, i32
  }
  func.func @transform_4(%arg0: i32) -> (i32, i32) {
    %c0_i32 = arith.constant 0 : i32
    %c0_i32_0 = arith.constant 0 : i32
    %c0_i32_1 = arith.constant 0 : i32
    return %c0_i32, %c0_i32_0 : i32, i32
  }
  func.func @transform_5(%arg0: i32) -> (i32, i32) {
    %c0_i32 = arith.constant 0 : i32
    %c0_i32_0 = arith.constant 0 : i32
    return %arg0, %c0_i32 : i32, i32
  }
}

</mosaic_0001>

<bundles_post_ra>
// kernel: tpu_custom_call.1
= control target key start
LH: loop header
LB: loop body
LE: loop exit
PB: predicated region body
PF: predicated region fallthrough
CT: control target
= control target key end

     0   :  { %10 = vsyncpa [#allocation3], 0  ;;  %s839_s0 = inlined_call_operand.vmem [shape: s32[32,1], index: 0, kind: input, shape index: {}]   ;;  %s840_s1 = inlined_call_operand.vmem [shape: s32[32,1], index: 1, kind: input, shape index: {}]   ;;  %s841_s2 = inlined_call_operand.vmem [shape: f32[56,128], index: 2, kind: input, shape index: {}]   ;;  %s842_s3 = inlined_call_operand.vmem [shape: f32[1,128], index: 3, kind: input, shape index: {}]   ;;  %s843_s4 = inlined_call_operand.vmem [shape: f32[1,128], index: 4, kind: input, shape index: {}]   ;;  %s844_s5 = inlined_call_operand.hbm [shape: f32[32,128], index: 5, kind: output, shape index: {}]  }
   0x1   :  { %12 = vsyncpa [#allocation3 + $0x1], 0  ;;  %s707_s18 = smov 0   ;;  %s709_s19 = smov 0  }
   0x2   :  { %s711_s20 = smov 0   ;;  %s713_s21 = smov 0  }
   0x3 LB: > { %s728_s22 = sadd.s32 4294967295, %s670_s21   ;;  %s500_s23 = sadd.s32 4294967294, %s670_s21   ;;  %s670_s21 = sphi %s713_s21, %s850_s21   ;;  %s666_s20 = sphi %s711_s20, %s849_s20   ;;  %s662_s19 = sphi %s709_s19, %s848_s19   ;;  %s658_s18 = sphi %s707_s18, %s847_s18  }
   0x4   : > { %s732_s24 = sadd.s32 1, %s670_s21   ;;  %s140_s25 = sadd.s32 1, %s666_s20 }
   0x5   : > { %s137_s26 = ssub.s32 %s670_s21, %s732_s24  ;;  %p150_p0 = scmp.ne.s32.totalorder %s666_s20, %s662_s19 }
   0x6   : > { %p138_p1 = scmp.eq.s32.totalorder %s137_s26, 0  ;;  %p151_p2 = scmp.eq.s32.totalorder %s728_s22, 1 }
   0x7   : > { %p156_p3 = scmp.ne.s32.totalorder %s662_s19, %s658_s18  ;;  %p157_p4 = scmp.eq.s32.totalorder %s500_s23, 1 }
   0x8   : > { %s743_s27 = scalar_select %p138_p1, %s666_s20, %s140_s25  }
   0x9   : > { %p745_p5 = por %p151_p2, %p150_p0  ;;  %p749_p6 = por %p157_p4, %p156_p3 }
   0xa   : > { %p503_p7 = scmp.ge.s32.totalorder %s670_s21, 1  ;;  %p202_p8 = scmp.lt.s32.totalorder %s670_s21, 3 }
   0xc   : > { %p203_p9 = pnand %p503_p7, %p202_p8 }
   0xd   : > { %s505_s30 = sshll.u32 (!%p203_p9), %s728_s22, 1  ;;  %v278_v0 = vld [vmem:[%s841_s2] sm:$0xff] (!%p203_p9)  ;;  %v279_v1 = vld [vmem:[%s841_s2 + $0x8] sm:$0xff] (!%p203_p9)  ;;  %v280_v2 = vld [vmem:[%s841_s2 + $0x10] sm:$0xff] (!%p203_p9)  ;;  %v672_v3 = vmov (!%p203_p9), 0   ;;  %v252_v17 = vlaneseq (!%p203_p9)  ;;  %vm285_vm5 = vcmask (!%p203_p9), 457728  }
   0xe   : > { %206 = sbr.rel (%p203_p9) target bundleno = 706 (0x2c2), region = 40  ;;  %603 = vset.pattern.permute.xlu1 (!%p203_p9), %v672_v3  ;;  %602 = vset.pattern.permute.xlu0 (!%p203_p9), %v672_v3  ;;  %p236_p10 = scmp.lt.s32.totalorder (!%p203_p9), %s505_s30, 3  ;;  %v547_v4 = vpack.c.bf16 (!%p203_p9), %v279_v1, %v278_v0  ;;  %v281_v5 = vld [vmem:[%s841_s2 + $0x18] sm:$0xff] (!%p203_p9)  ;;  %v282_v12 = vld [vmem:[%s841_s2 + $0x20] sm:$0xff] (!%p203_p9)  ;;  %v283_v13 = vld [vmem:[%s841_s2 + $0x28] sm:$0xff] (!%p203_p9)  ;;  %v673_v23 = vmov (!%p203_p9), 0.0  }
   0xf   : > { %v551_v6 = vpack.c.bf16 (!%p203_p9), %v281_v5, %v280_v2  ;;  %v555_v15 = vpack.c.bf16 (!%p203_p9), %v283_v13, %v282_v12  ;;  %v284_v16 = vld [vmem:[%s841_s2 + $0x30] sm:$0xff] (!%p203_p9)  ;;  %v253_v20 = vand.u32 (!%p203_p9), 127, %v252_v17  ;;  %s232_s11 = sand.u32 (!%p203_p9), 1, %s662_s19   ;;  %v513_v45 = vld [vmem:[%s842_s3] ss:$0 sm:$0xff] (!%p203_p9) }
  0x10   : > { %548 = vmatprep.subr.bf16.mxu0 (!%p203_p9), %v547_v4  ;;  %v514_v47 = vld [vmem:[%s843_s4] ss:$0 sm:$0xff] (!%p203_p9) }
  0x11   : > { %550 = vmatpush3.bf16.msra.mxu0 (!%p203_p9), %v547_v4  ;;  %vm375_vm7 = vcmp.lt.s32.totalorder (!%p203_p9), %v253_v20, 32 }
  0x12   : > { %552 = vmatprep.subr.bf16.mxu0 (!%p203_p9), %v551_v6 }
  0x15   : > { %s852_s30 = smov (!%p236_p10, %s505_s30), 3  ;;  %554 = vmatpush3.bf16.msra.mxu0 %v551_v6 }
  0x16   : > { %s506_s14 = sshll.u32 %s852_s30, 3  ;;  %556 = vmatprep.subr.bf16.mxu0 %v555_v15  ;;  %s798_s30 = scalar_lea.sflag [#allocation3], %s232_s11 }
  0x17   : > { %s239_s17 = scalar_lea.vmem %s839_s0, %s506_s14  ;;  %s245_s26 = scalar_lea.vmem %s840_s1, %s506_s14 }
  0x18   : > { %v249_v7 = vld [vmem:[%s239_s17 + $0x8] sm:$0xff]  ;;  %v248_v8 = vld [vmem:[%s239_s17] sm:$0xff]  ;;  %s504_s14 = sshll.u32 %s232_s11, 4  ;;  %s520_s17 = sshll.u32 %s728_s22, 8 }
  0x19   : > { %v251_v9 = vld [vmem:[%s245_s26 + $0x8] sm:$0xff]  ;;  %258 = vperm.xlu1 %603, %v249_v7   ;;  %255 = vperm.xlu0 %602, %v248_v8   ;;  %v250_v11 = vld [vmem:[%s245_s26] sm:$0xff]  ;;  %s234_s23 = scalar_lea.vmem [#allocation2], %s504_s14  ;;  %s794_s7 = scalar_lea.hbm %s844_s5, %s520_s17 }
  0x1a   : > { %v263_v10 = vadd.s32 24, %v251_v9  ;;  %v262_v14 = vadd.s32 24, %v250_v11  ;;  %558 = vmatpush3.bf16.msra.mxu0 %v555_v15  ;;  %s426_s25 = sshll.u32 %s234_s23, 4  ;;  %s674_s22 = smov [#allocation2]   ;;  %s796_s25 = int_to_ptr.vmem [resolvable:$true] %s426_s25 }
  0x1b   : > { %542 = vmatprep.subr.mxu0 %v284_v16  ;;  %s608_s8 = scalar_lea.vmem %s796_s25, 256  ;;  %s612_s9 = sshll.u32 %s674_s22, 4  ;;  %s613_s9 = int_to_ptr.vmem [resolvable:$false] %s612_s9 }
  0x1c   : > { %p609_p11 = scmp.ne.s32.totalorder %s796_s25, %s608_s8  ;;  %s614_s10 = scalar_lea.vmem %s613_s9, 512 }
  0x1d   : > { %268 = vperm.xlu1 %603, %v263_v10   ;;  %265 = vperm.xlu0 %602, %v262_v14   ;;  %p615_p0 = scmp.lt.s32.totalorder %s796_s25, %s613_s9  ;;  %p616_p1 = scmp.lt.s32.totalorder %s614_s10, %s608_s8 }
  0x1e   : > { %543 = vmatpush3.msra.mxu0 %v284_v16  ;;  %p610_p12 = pnand %p609_p11, %p745_p5 }
  0x1f   : > { %p617_p2 = por %p616_p1, %p615_p0 }
  0x20   : > { %p611_p13 = pneg %p610_p12 }
  0x22   : > { %p618_p3 = pnand %p617_p2, %p611_p13 }
  0x98   : > { %v259_v18 = vpop.permute.xlu1 %258  ;;  %v256_v19 = vpop.permute.xlu0 %255 }
  0x99   : > { %vm261_vm0 = vcmp.eq.s32.totalorder %v253_v20, %v259_v18  ;;  %vm260_vm3 = vcmp.eq.s32.totalorder %v253_v20, %v256_v19 }
  0x9c   : > { %v269_v21 = vpop.permute.xlu1 %268  ;;  %v266_v22 = vpop.permute.xlu0 %265 }
  0x9d   : > { %vm271_vm1 = vcmp.eq.s32.totalorder %v253_v20, %v269_v21  ;;  %vm270_vm2 = vcmp.eq.s32.totalorder %v253_v20, %v266_v22 }
  0x9e   : > { %vm273_vm4 = vmor %vm261_vm0, %vm271_vm1 }
  0x9f   : > { %vm272_vm6 = vmor %vm260_vm3, %vm270_vm2  ;;  %v510_v24 = vsel %vm273_vm4, 1.0, %v673_v23 }
  0xa0   : > { %v509_v25 = vsel %vm272_vm6, 1.0, %v673_v23 }
  0xa1   : > { %544 = vmatprep.mubr.msk.f32.mxu0 %vm285_vm5, %v509_v25 }
  0xa2   : > { %545 = vmatmul.mubr.msk.f32.vlgmr.msra.gmra.mrb[0].mxu0 %vm285_vm5, %v510_v24 }
 0x175   : > { %v546_v26 = vpop.f32.mrb[0].mxu0 }
 0x176   : > { %369 = vadd.xlane.f32.xlu1 %v546_v26  ;;  %v358_v27 = vpop.f32.mrb[1].mxu0 }
 0x177   : > { %367 = vadd.xlane.f32.xlu0 %v358_v27 }
 0x203   : > { %v370_v28 = vpop.xlane.xlu1 %369 }
 0x204   : > { %v372_v29 = vmul.f32 0.03125, %v370_v28  ;;  %v368_v30 = vpop.xlane.xlu0 %367 }
 0x205   : > { %v371_v31 = vmul.f32 0.03125, %v368_v30 }
 0x206   : > { %v374_v32 = vsub.f32 %v546_v26, %v372_v29 }
 0x207   : > { %v373_v33 = vsub.f32 %v358_v27, %v371_v31 }
 0x208   : > { %v377_v36 = vsel %vm375_vm7, %v374_v32, 0.0 }
 0x209   : > { %v376_v34 = vsel %vm375_vm7, %v373_v33, 0.0  ;;  %v379_v37 = vmul.f32 %v377_v36, %v377_v36 }
 0x20a   : > { %v378_v35 = vmul.f32 %v376_v34, %v376_v34 }
 0x20c   : > { %380 = vadd.xlane.f32.xlu0 %v378_v35 }
 0x210   : > { %382 = vadd.xlane.f32.xlu0 %v379_v37 }
 0x299   : > { %v381_v38 = vpop.xlane.xlu0 %380 }
 0x29a   : > { %v384_v39 = vmul.f32 0.03125, %v381_v38 }
 0x29c   : > { %v386_v40 = vadd.f32 1e-12, %v384_v39 }
 0x29d   : > { %v383_v41 = vpop.xlane.xlu0 %382 }
 0x29e   : > { %604 = vrsqrt.f32 %v386_v40  ;;  %v385_v42 = vmul.f32 0.03125, %v383_v41 }
 0x2a0   : > { %v387_v43 = vadd.f32 1e-12, %v385_v42 }
 0x2a2   : > { %606 = vrsqrt.f32 %v387_v43 }
 0x2a8   : > { %v605_v44 = vpop.eup %604 }
 0x2a9   : > { %v390_v46 = vmul.f32 %v605_v44, %v376_v34 }
 0x2ab   : > { %v399_v48 = vmul.f32 %v513_v45, %v390_v46 }
 0x2ac   : > { %v607_v49 = vpop.eup %606 }
 0x2ad   : > { %v391_v50 = vmul.f32 %v607_v49, %v377_v36  ;;  %v408_v51 = vadd.f32 %v514_v47, %v399_v48 }
 0x2af   : > { %v400_v52 = vmul.f32 %v513_v45, %v391_v50  ;;  %410 = vst [vmem:[%s234_s23] sm:$0xff] %v408_v51 }
 0x2b1   : > { %v409_v53 = vadd.f32 %v514_v47, %v400_v52 }
 0x2b3   : > { %411 = vst [vmem:[%s234_s23 + $0x8] sm:$0xff] %v409_v53 }
 0x2b4   : > { %621 = shalt.err (!%p618_p3)
}
 0x2b5   : > { %s622_s11 = scalar_lea.hbm %s794_s7, 256  ;;  %s626_s14 = scalar_lea.hbm %s844_s5, 512 }
 0x2b6   : > { %p623_p4 = scmp.ne.s32.totalorder %s794_s7, %s622_s11  ;;  %p627_p9 = scmp.lt.u32.totalorder %s794_s7, %s844_s5 }
 0x2b7   : > { %p628_p10 = scmp.lt.u32.totalorder %s626_s14, %s622_s11  ;;  %p630_p12 = scmp.lt.u32.totalorder %s622_s11, %s794_s7 }
 0x2b8   : > { %p624_p7 = pnand %p623_p4, %p745_p5 }
 0x2b9   : > { %p629_p11 = por %p628_p10, %p627_p9 }
 0x2ba   : > { %p625_p8 = pneg %p624_p7 }
 0x2bb   : > { %p631_p13 = por %p630_p12, %p629_p11 }
 0x2bd   : > { %p632_p0 = pnand %p631_p13, %p625_p8 }
 0x2bf   : > { %635 = shalt.err (!%p632_p0)
}
 0x2c0   : > { %s675_s17 = smov 128   ;;  %s676_s23 = smov 8  }
 0x2c1   : > { %559 = dma.vmem_to_hbm [thread:$0]  (%p745_p5), %s796_s25, 256, %s794_s7, %s798_s30, %s675_s17, %s675_s17, %s676_s23  }
 0x2c2 PF: > { %p565_p1 = scmp.ge.s32.totalorder %s670_s21, 2  ;;  %s441_s26 = sand.u32 1, %s658_s18  }
 0x2c3   : > { %s442_s6 = scalar_lea.sflag [#allocation3], %s441_s26 }
 0x2c4   : > { %p562_p2 = pnand %p565_p1, %p749_p6 }
 0x2c6   : > { %653 = dma.done.wait (!%p562_p2), %s442_s6, 256  }
 0x2c7   : > { %655 = vsyncadd (!%p562_p2), %s442_s6, 4294967040  ;;  %p15_p3 = scmp.ge.s32.totalorder %s732_s24, 4   ;;  %s847_s18 = smov %s662_s19 }
 0x2c8   : > { %s848_s19 = smov %s666_s20  ;;  %s849_s20 = smov %s743_s27 }
 0x2c9   : > { %s850_s21 = smov %s732_s24  ;;  %17 = sbr.rel (!%p15_p3) target bundleno = 3 (0x3), region = 78 }
 0x2d0   :  { %447 = vsyncpa [#allocation3], 1 }
 0x2d1   :  { %449 = vsyncpa [#allocation3 + $0x1], 1 }

</bundles_post_ra>
